<compile_context>
chip_gen: v7x
topology: tpu7x:2x2x1
jax: 0.10.0
libtpu: 0.0.40
codegen_flags: <defaults>
</compile_context>

<pallas_src>
import jax
import jax.numpy as jnp
from jax.experimental import pallas as pl
from jax.experimental.pallas import tpu as pltpu

# ---- small synthetic config (Siglip2VisionConfig fields used by the module) ----
HIDDEN = 32           # config.hidden_size (embed_dim)
NUM_HEADS = 4         # config.num_attention_heads
HEAD_DIM = HIDDEN // NUM_HEADS
SCALE = HEAD_DIM ** -0.5


# ----------------------------- fused Pallas kernel ------------------------------

def _flash_attn_kernel(xq_ref, xkv_ref, wq_ref, wk_ref, wv_ref,
                       bq_ref, bk_ref, bv_ref, wo_ref, bo_ref,
                       o_ref, q_scr, m_scr, l_scr, acc_scr):
    """Grid = (B, T//tq, H, T//tk); one (batch, q-tile, head, kv-tile) per step.

    xq_ref : (1, tq, C)  bf16  activations for the q-row tile
    xkv_ref: (1, tk, C)  bf16  activations for the current K/V tile
    wq_ref : (1, C, Dh)  bf16  per-head q weights (softmax scale folded in)
    wk_ref : (1, C, Dh)  bf16  per-head k weights
    wv_ref : (1, C, Dh)  bf16  per-head v weights
    bq_ref : (1, 1, Dh)  f32   per-head q bias (scale folded in)
    bk_ref : (1, 1, Dh)  f32
    bv_ref : (1, 1, Dh)  f32
    wo_ref : (1, Dh, C)  bf16  per-head out-projection slab
    bo_ref : (1, C)      f32   out-projection bias (added once, at h == 0)
    o_ref  : (1, tq, C)  f32   output block (resident across h / kj)
    q_scr  : (tq, Dh)    bf16  scratch: projected q tile
    m_scr  : (tq, 1)     f32   scratch: running row max
    l_scr  : (tq, 1)     f32   scratch: running row sum
    acc_scr: (tq, Dh)    f32   scratch: unnormalized attention accumulator
    """
    h = pl.program_id(2)
    kj = pl.program_id(3)
    cdims = (((1,), (0,)), ((), ()))     # contract lhs last dim with rhs first dim

    # -- once per (b, qi, h): project the q tile, reset online-softmax state --
    @pl.when(kj == 0)
    def _():
        q = jax.lax.dot_general(xq_ref[0], wq_ref[0], cdims,
                                preferred_element_type=jnp.float32) + bq_ref[0]
        q_scr[...] = q.astype(jnp.bfloat16)
        m_scr[...] = jnp.full(m_scr.shape, -jnp.inf, dtype=m_scr.dtype)
        l_scr[...] = jnp.zeros(l_scr.shape, dtype=l_scr.dtype)
        acc_scr[...] = jnp.zeros(acc_scr.shape, dtype=acc_scr.dtype)

    # -- project this K/V tile (bf16 MXU, f32 accumulation) --
    xkv = xkv_ref[0]
    k = (jax.lax.dot_general(xkv, wk_ref[0], cdims,
                             preferred_element_type=jnp.float32)
         + bk_ref[0]).astype(jnp.bfloat16)
    v = (jax.lax.dot_general(xkv, wv_ref[0], cdims,
                             preferred_element_type=jnp.float32)
         + bv_ref[0]).astype(jnp.bfloat16)

    # -- scores: contract the head dims directly (q . k^T) --
    # TODO(synk): check lowered MLIR for a vxpose of k; if present, stage k
    # pre-transposed as (Dh, tk).
    s = jax.lax.dot_general(q_scr[...], k, (((1,), (1,)), ((), ())),
                            preferred_element_type=jnp.float32)    # (tq, tk) f32

    # -- online softmax: unnormalized accumulation; normalize only at the end --
    m_prev = m_scr[...]
    m_new = jnp.maximum(m_prev, jnp.max(s, axis=-1, keepdims=True))
    alpha = jnp.exp(m_prev - m_new)
    p = jnp.exp(s - m_new)                                          # f32 (v5e-safe)
    l_scr[...] = alpha * l_scr[...] + jnp.sum(p, axis=-1, keepdims=True)
    acc_scr[...] = alpha * acc_scr[...] + jax.lax.dot_general(
        p.astype(jnp.bfloat16), v, cdims,
        preferred_element_type=jnp.float32)                         # (tq, Dh)
    m_scr[...] = m_new

    # -- last K/V tile: normalize, out-project this head, accumulate into out --
    @pl.when(kj == pl.num_programs(3) - 1)
    def _():
        o_h = acc_scr[...] * pl.reciprocal(l_scr[...], approx=True)   # (tq, Dh)
        contrib = jax.lax.dot_general(o_h.astype(jnp.bfloat16), wo_ref[0], cdims,
                                      preferred_element_type=jnp.float32)  # (tq, C)

        @pl.when(h == 0)
        def _():
            o_ref[0] = contrib + bo_ref[...]

        @pl.when(h > 0)
        def _():
            o_ref[0] = o_ref[0] + contrib


# ------------------------------ wrapper -----------------------------------

def _prepare_params(params):
    """One-time parameter re-layout (would live at weight-load time in prod)."""
    C, H, Dh = HIDDEN, NUM_HEADS, HEAD_DIM
    wq, wk, wv = jnp.split(params["w_qkv"], 3, axis=1)    # each (C, C)
    bq, bk, bv = jnp.split(params["b_qkv"], 3)            # each (C,)

    def per_head_w(w):   # (C, C) -> (H, C, Dh): lane-dense per-head slabs
        return jnp.transpose(w.reshape(C, H, Dh), (1, 0, 2))

    def per_head_b(b):   # (C,) -> (H, 1, Dh)
        return b.reshape(H, 1, Dh)

    return dict(
        wq=(per_head_w(wq) * SCALE).astype(jnp.bfloat16),   # scale folded in
        wk=per_head_w(wk).astype(jnp.bfloat16),
        wv=per_head_w(wv).astype(jnp.bfloat16),
        bq=(per_head_b(bq) * SCALE).astype(jnp.float32),
        bk=per_head_b(bk).astype(jnp.float32),
        bv=per_head_b(bv).astype(jnp.float32),
        wo=params["w_out"].reshape(H, Dh, C).astype(jnp.bfloat16),
        bo=params["b_out"].reshape(1, C).astype(jnp.float32),
    )


def siglip2_attention_forward(hidden_states, params, *, tq=None, tk=None):
    """Replicates Siglip2Attention.forward. Returns (attn_output, None)."""
    B, T, C = hidden_states.shape
    H, Dh = NUM_HEADS, HEAD_DIM
    assert C == HIDDEN

    tq = min(T, 512) if tq is None else tq
    tk = min(T, 512) if tk is None else tk
    assert T % tq == 0 and T % tk == 0
    assert (tq % 8 == 0 or tq == T) and (tk % 8 == 0 or tk == T)
    nq, nk = T // tq, T // tk

    p = _prepare_params(params)
    x_bf = hidden_states.astype(jnp.bfloat16)   # halve activation HBM->VMEM DMA

    out = pl.pallas_call(
        _flash_attn_kernel,
        out_shape=jax.ShapeDtypeStruct((B, T, C), jnp.float32),
        grid=(B, nq, H, nk),
        in_specs=[
            pl.BlockSpec((1, tq, C), lambda b, qi, h, kj: (b, qi, 0)),   # x (q rows)
            pl.BlockSpec((1, tk, C), lambda b, qi, h, kj: (b, kj, 0)),   # x (kv rows)
            pl.BlockSpec((1, C, Dh), lambda b, qi, h, kj: (h, 0, 0)),    # w_q[h]
            pl.BlockSpec((1, C, Dh), lambda b, qi, h, kj: (h, 0, 0)),    # w_k[h]
            pl.BlockSpec((1, C, Dh), lambda b, qi, h, kj: (h, 0, 0)),    # w_v[h]
            pl.BlockSpec((1, 1, Dh), lambda b, qi, h, kj: (h, 0, 0)),    # b_q[h]
            pl.BlockSpec((1, 1, Dh), lambda b, qi, h, kj: (h, 0, 0)),    # b_k[h]
            pl.BlockSpec((1, 1, Dh), lambda b, qi, h, kj: (h, 0, 0)),    # b_v[h]
            pl.BlockSpec((1, Dh, C), lambda b, qi, h, kj: (h, 0, 0)),    # w_out[h]
            pl.BlockSpec((1, C),     lambda b, qi, h, kj: (0, 0)),       # b_out
        ],
        out_specs=pl.BlockSpec((1, tq, C), lambda b, qi, h, kj: (b, qi, 0)),
        scratch_shapes=[
            pltpu.VMEM((tq, Dh), jnp.bfloat16),   # projected q tile
            pltpu.VMEM((tq, 1), jnp.float32),     # running max m
            pltpu.VMEM((tq, 1), jnp.float32),     # running sum l
            pltpu.VMEM((tq, Dh), jnp.float32),    # unnormalized accumulator
        ],
        compiler_params=pltpu.CompilerParams(
            dimension_semantics=("parallel", "parallel", "arbitrary", "arbitrary"),
            # Explicit VMEM budget; re-derive with the tile plan per generation
            # (larger on v5e/v6e's 128 MiB, keep headroom on v7x's 64 MiB).
            vmem_limit_bytes=32 * 1024 * 1024,
        ),
    )(x_bf, x_bf, p["wq"], p["wk"], p["wv"], p["bq"], p["bk"], p["bv"],
      p["wo"], p["bo"])

    return out, None


# ------------------------------ reference ----------------------------------

def _reference_forward(hidden_states, params):
    """Pure-JAX f32 reference (module semantics) for correctness check."""
    B, T, C = hidden_states.shape
    x = hidden_states.reshape(B * T, C)
    qkv = x @ params["w_qkv"] + params["b_qkv"]
    q, k, v = jnp.split(qkv, 3, axis=-1)

    def heads(t):
        return jnp.transpose(t.reshape(B, T, NUM_HEADS, HEAD_DIM), (0, 2, 1, 3))

    qh, kh, vh = heads(q), heads(k), heads(v)
    s = jnp.einsum("bhqd,bhkd->bhqk", qh, kh) * SCALE
    p = jax.nn.softmax(s, axis=-1)
    o = jnp.einsum("bhqk,bhkd->bhqd", p, vh)
    o = jnp.transpose(o, (0, 2, 1, 3)).reshape(B * T, C)
    out = o @ params["w_out"] + params["b_out"]
    return out.reshape(B, T, C)


# -------------------------------- main --------------------------------------

if __name__ == "__main__":
    key = jax.random.PRNGKey(0)
    k_x, k_wqkv, k_bqkv, k_wout, k_bout = jax.random.split(key, 5)

    B, T = 2, 8
    hidden_states = jax.random.normal(k_x, (B, T, HIDDEN), dtype=jnp.float32)

    params = {
        "w_qkv": 0.02 * jax.random.normal(k_wqkv, (HIDDEN, 3 * HIDDEN), jnp.float32),
        "b_qkv": 0.01 * jax.random.normal(k_bqkv, (3 * HIDDEN,), jnp.float32),
        "w_out": 0.02 * jax.random.normal(k_wout, (HIDDEN, HIDDEN), jnp.float32),
        "b_out": 0.01 * jax.random.normal(k_bout, (HIDDEN,), jnp.float32),
    }

    out, aux = siglip2_attention_forward(hidden_states, params)
    out = jax.block_until_ready(out)
    assert aux is None
    assert out.shape == (B, T, HIDDEN)

    ref = _reference_forward(hidden_states, params)
    # bf16 MXU operands + approx reciprocal -> compare against the f32
    # reference with a correspondingly relaxed tolerance.
    assert jnp.allclose(out, ref, atol=2e-2, rtol=2e-2), "mismatch vs reference"

    print("KERNEL_OK")
</pallas_src>

<mosaic_0001>
module attributes {stable_mosaic.version = 11 : i64} {
  func.func @_flash_attn_kernel(%arg0: i32, %arg1: i32, %arg2: i32, %arg3: i32, %arg4: memref<1x8x32xbf16, #tpu.memory_space<vmem>>, %arg5: memref<1x8x32xbf16, #tpu.memory_space<vmem>>, %arg6: memref<1x32x8xbf16, #tpu.memory_space<vmem>>, %arg7: memref<1x32x8xbf16, #tpu.memory_space<vmem>>, %arg8: memref<1x32x8xbf16, #tpu.memory_space<vmem>>, %arg9: memref<1x1x8xf32, #tpu.memory_space<vmem>>, %arg10: memref<1x1x8xf32, #tpu.memory_space<vmem>>, %arg11: memref<1x1x8xf32, #tpu.memory_space<vmem>>, %arg12: memref<1x8x32xbf16, #tpu.memory_space<vmem>>, %arg13: memref<1x32xf32, #tpu.memory_space<vmem>>, %arg14: memref<1x8x32xf32, #tpu.memory_space<vmem>>, %arg15: memref<8x8xbf16, #tpu.memory_space<vmem>>, %arg16: memref<8x1xf32, #tpu.memory_space<vmem>>, %arg17: memref<8x1xf32, #tpu.memory_space<vmem>>, %arg18: memref<8x8xf32, #tpu.memory_space<vmem>>) attributes {dimension_semantics = [#tpu.dimension_semantics<parallel>, #tpu.dimension_semantics<parallel>, #tpu.dimension_semantics<arbitrary>, #tpu.dimension_semantics<arbitrary>], iteration_bounds = array<i64: 2, 1, 4, 1>, scalar_prefetch = 0 : i64, scratch_operands = 4 : i64, tpu.core_type = #tpu.core_type<tc>, window_params = [{transform_indices = @transform_0, window_bounds = array<i64: 1, 8, 32>}, {transform_indices = @transform_1, window_bounds = array<i64: 1, 8, 32>}, {transform_indices = @transform_2, window_bounds = array<i64: 1, 32, 8>}, {transform_indices = @transform_3, window_bounds = array<i64: 1, 32, 8>}, {transform_indices = @transform_4, window_bounds = array<i64: 1, 32, 8>}, {transform_indices = @transform_5, window_bounds = array<i64: 1, 1, 8>}, {transform_indices = @transform_6, window_bounds = array<i64: 1, 1, 8>}, {transform_indices = @transform_7, window_bounds = array<i64: 1, 1, 8>}, {transform_indices = @transform_8, window_bounds = array<i64: 1, 8, 32>}, {pipeline_mode = #tpu.pipeline_mode<synchronous>, transform_indices = @transform_9, window_bounds = array<i64: 1, 32>}, {transform_indices = @transform_10, window_bounds = array<i64: 1, 8, 32>}]} {
    %c0_i32 = arith.constant 0 : i32
    %0 = arith.cmpi eq, %arg3, %c0_i32 : i32
    %1 = arith.extui %0 : i1 to i32
    %c0_i32_0 = arith.constant 0 : i32
    %2 = arith.cmpi ne, %1, %c0_i32_0 : i32
    scf.if %2 {
      %c0_36 = arith.constant 0 : index
      %c0_37 = arith.constant 0 : index
      %c0_38 = arith.constant 0 : index
      %49 = vector.load %arg4[%c0_36, %c0_37, %c0_38] : memref<1x8x32xbf16, #tpu.memory_space<vmem>>, vector<1x8x32xbf16>
      %50 = vector.shape_cast %49 : vector<1x8x32xbf16> to vector<8x32xbf16>
      %c0_39 = arith.constant 0 : index
      %c0_40 = arith.constant 0 : index
      %c0_41 = arith.constant 0 : index
      %51 = vector.load %arg6[%c0_39, %c0_40, %c0_41] : memref<1x32x8xbf16, #tpu.memory_space<vmem>>, vector<1x32x8xbf16>
      %52 = vector.shape_cast %51 : vector<1x32x8xbf16> to vector<32x8xbf16>
      %cst_42 = arith.constant dense<0.000000e+00> : vector<8x8xf32>
      %53 = tpu.matmul %50, %52, %cst_42 {dimension_numbers = #tpu.dot_dimension_numbers<[1], [0], [0], [1], [0, 0, 1, 1], [], []>} : vector<8x32xbf16>, vector<32x8xbf16>, vector<8x8xf32> -> vector<8x8xf32>
      %c0_43 = arith.constant 0 : index
      %c0_44 = arith.constant 0 : index
      %c0_45 = arith.constant 0 : index
      %54 = vector.load %arg9[%c0_43, %c0_44, %c0_45] : memref<1x1x8xf32, #tpu.memory_space<vmem>>, vector<1x1x8xf32>
      %55 = vector.shape_cast %54 : vector<1x1x8xf32> to vector<1x8xf32>
      %56 = vector.broadcast %55 : vector<1x8xf32> to vector<8x8xf32>
      %57 = arith.addf %53, %56 : vector<8x8xf32>
      %58 = arith.truncf %57 : vector<8x8xf32> to vector<8x8xbf16>
      %c0_46 = arith.constant 0 : index
      %c0_47 = arith.constant 0 : index
      %59 = vector.load %arg15[%c0_46, %c0_47] : memref<8x8xbf16, #tpu.memory_space<vmem>>, vector<8x8xbf16>
      tpu.vector_store %arg15[%c0_46, %c0_47], %58 {strides = array<i32>} : memref<8x8xbf16, #tpu.memory_space<vmem>>, vector<8x8xbf16>,
      %cst_48 = arith.constant 0xFF800000 : f32
      %60 = vector.broadcast %cst_48 : f32 to vector<8x1xf32>
      %c0_49 = arith.constant 0 : index
      %c0_50 = arith.constant 0 : index
      %61 = vector.load %arg16[%c0_49, %c0_50] : memref<8x1xf32, #tpu.memory_space<vmem>>, vector<8x1xf32>
      tpu.vector_store %arg16[%c0_49, %c0_50], %60 {strides = array<i32>} : memref<8x1xf32, #tpu.memory_space<vmem>>, vector<8x1xf32>,
      %cst_51 = arith.constant 0.000000e+00 : f32
      %62 = vector.broadcast %cst_51 : f32 to vector<8x1xf32>
      %c0_52 = arith.constant 0 : index
      %c0_53 = arith.constant 0 : index
      %63 = vector.load %arg17[%c0_52, %c0_53] : memref<8x1xf32, #tpu.memory_space<vmem>>, vector<8x1xf32>
      tpu.vector_store %arg17[%c0_52, %c0_53], %62 {strides = array<i32>} : memref<8x1xf32, #tpu.memory_space<vmem>>, vector<8x1xf32>,
      %cst_54 = arith.constant 0.000000e+00 : f32
      %64 = vector.broadcast %cst_54 : f32 to vector<8x8xf32>
      %c0_55 = arith.constant 0 : index
      %c0_56 = arith.constant 0 : index
      %65 = vector.load %arg18[%c0_55, %c0_56] : memref<8x8xf32, #tpu.memory_space<vmem>>, vector<8x8xf32>
      tpu.vector_store %arg18[%c0_55, %c0_56], %64 {strides = array<i32>} : memref<8x8xf32, #tpu.memory_space<vmem>>, vector<8x8xf32>,
    } else {
    }
    %c0 = arith.constant 0 : index
    %c0_1 = arith.constant 0 : index
    %c0_2 = arith.constant 0 : index
    %3 = vector.load %arg5[%c0, %c0_1, %c0_2] : memref<1x8x32xbf16, #tpu.memory_space<vmem>>, vector<1x8x32xbf16>
    %4 = vector.shape_cast %3 : vector<1x8x32xbf16> to vector<8x32xbf16>
    %c0_3 = arith.constant 0 : index
    %c0_4 = arith.constant 0 : index
    %c0_5 = arith.constant 0 : index
    %5 = vector.load %arg7[%c0_3, %c0_4, %c0_5] : memref<1x32x8xbf16, #tpu.memory_space<vmem>>, vector<1x32x8xbf16>
    %6 = vector.shape_cast %5 : vector<1x32x8xbf16> to vector<32x8xbf16>
    %cst = arith.constant dense<0.000000e+00> : vector<8x8xf32>
    %7 = tpu.matmul %4, %6, %cst {dimension_numbers = #tpu.dot_dimension_numbers<[1], [0], [0], [1], [0, 0, 1, 1], [], []>} : vector<8x32xbf16>, vector<32x8xbf16>, vector<8x8xf32> -> vector<8x8xf32>
    %c0_6 = arith.constant 0 : index
    %c0_7 = arith.constant 0 : index
    %c0_8 = arith.constant 0 : index
    %8 = vector.load %arg10[%c0_6, %c0_7, %c0_8] : memref<1x1x8xf32, #tpu.memory_space<vmem>>, vector<1x1x8xf32>
    %9 = vector.shape_cast %8 : vector<1x1x8xf32> to vector<1x8xf32>
    %10 = vector.broadcast %9 : vector<1x8xf32> to vector<8x8xf32>
    %11 = arith.addf %7, %10 : vector<8x8xf32>
    %12 = arith.truncf %11 : vector<8x8xf32> to vector<8x8xbf16>
    %c0_9 = arith.constant 0 : index
    %c0_10 = arith.constant 0 : index
    %c0_11 = arith.constant 0 : index
    %13 = vector.load %arg8[%c0_9, %c0_10, %c0_11] : memref<1x32x8xbf16, #tpu.memory_space<vmem>>, vector<1x32x8xbf16>
    %14 = vector.shape_cast %13 : vector<1x32x8xbf16> to vector<32x8xbf16>
    %cst_12 = arith.constant dense<0.000000e+00> : vector<8x8xf32>
    %15 = tpu.matmul %4, %14, %cst_12 {dimension_numbers = #tpu.dot_dimension_numbers<[1], [0], [0], [1], [0, 0, 1, 1], [], []>} : vector<8x32xbf16>, vector<32x8xbf16>, vector<8x8xf32> -> vector<8x8xf32>
    %c0_13 = arith.constant 0 : index
    %c0_14 = arith.constant 0 : index
    %c0_15 = arith.constant 0 : index
    %16 = vector.load %arg11[%c0_13, %c0_14, %c0_15] : memref<1x1x8xf32, #tpu.memory_space<vmem>>, vector<1x1x8xf32>
    %17 = vector.shape_cast %16 : vector<1x1x8xf32> to vector<1x8xf32>
    %18 = vector.broadcast %17 : vector<1x8xf32> to vector<8x8xf32>
    %19 = arith.addf %15, %18 : vector<8x8xf32>
    %20 = arith.truncf %19 : vector<8x8xf32> to vector<8x8xbf16>
    %c0_16 = arith.constant 0 : index
    %c0_17 = arith.constant 0 : index
    %21 = vector.load %arg15[%c0_16, %c0_17] : memref<8x8xbf16, #tpu.memory_space<vmem>>, vector<8x8xbf16>
    %cst_18 = arith.constant dense<0.000000e+00> : vector<8x8xf32>
    %22 = tpu.matmul %21, %12, %cst_18 {dimension_numbers = #tpu.dot_dimension_numbers<[1], [1], [0], [0], [0, 0, 1, 0], [], []>} : vector<8x8xbf16>, vector<8x8xbf16>, vector<8x8xf32> -> vector<8x8xf32>
    %c0_19 = arith.constant 0 : index
    %c0_20 = arith.constant 0 : index
    %23 = vector.load %arg16[%c0_19, %c0_20] : memref<8x1xf32, #tpu.memory_space<vmem>>, vector<8x1xf32>
    %cst_21 = arith.constant dense<0xFF800000> : vector<8xf32>
    %24 = vector.multi_reduction <maximumf>, %22, %cst_21 [1] : vector<8x8xf32> to vector<8xf32>
    %25 = vector.shape_cast %24 : vector<8xf32> to vector<8x1xf32>
    %26 = arith.maximumf %23, %25 : vector<8x1xf32>
    %27 = arith.subf %23, %26 : vector<8x1xf32>
    %28 = math.exp %27 : vector<8x1xf32>
    %29 = vector.broadcast %26 : vector<8x1xf32> to vector<8x8xf32>
    %30 = arith.subf %22, %29 : vector<8x8xf32>
    %31 = math.exp %30 : vector<8x8xf32>
    %c0_22 = arith.constant 0 : index
    %c0_23 = arith.constant 0 : index
    %32 = vector.load %arg17[%c0_22, %c0_23] : memref<8x1xf32, #tpu.memory_space<vmem>>, vector<8x1xf32>
    %33 = arith.mulf %28, %32 : vector<8x1xf32>
    %cst_24 = arith.constant dense<0.000000e+00> : vector<8xf32>
    %34 = vector.multi_reduction <add>, %31, %cst_24 [1] : vector<8x8xf32> to vector<8xf32>
    %35 = vector.shape_cast %34 : vector<8xf32> to vector<8x1xf32>
    %36 = arith.addf %33, %35 : vector<8x1xf32>
    %c0_25 = arith.constant 0 : index
    %c0_26 = arith.constant 0 : index
    %37 = vector.load %arg17[%c0_25, %c0_26] : memref<8x1xf32, #tpu.memory_space<vmem>>, vector<8x1xf32>
    tpu.vector_store %arg17[%c0_25, %c0_26], %36 {strides = array<i32>} : memref<8x1xf32, #tpu.memory_space<vmem>>, vector<8x1xf32>,
    %c0_27 = arith.constant 0 : index
    %c0_28 = arith.constant 0 : index
    %38 = vector.load %arg18[%c0_27, %c0_28] : memref<8x8xf32, #tpu.memory_space<vmem>>, vector<8x8xf32>
    %39 = vector.broadcast %28 : vector<8x1xf32> to vector<8x8xf32>
    %40 = arith.mulf %39, %38 : vector<8x8xf32>
    %41 = arith.truncf %31 : vector<8x8xf32> to vector<8x8xbf16>
    %cst_29 = arith.constant dense<0.000000e+00> : vector<8x8xf32>
    %42 = tpu.matmul %41, %20, %cst_29 {dimension_numbers = #tpu.dot_dimension_numbers<[1], [0], [0], [1], [0, 0, 1, 1], [], []>} : vector<8x8xbf16>, vector<8x8xbf16>, vector<8x8xf32> -> vector<8x8xf32>
    %43 = arith.addf %40, %42 : vector<8x8xf32>
    %c0_30 = arith.constant 0 : index
    %c0_31 = arith.constant 0 : index
    %44 = vector.load %arg18[%c0_30, %c0_31] : memref<8x8xf32, #tpu.memory_space<vmem>>, vector<8x8xf32>
    tpu.vector_store %arg18[%c0_30, %c0_31], %43 {strides = array<i32>} : memref<8x8xf32, #tpu.memory_space<vmem>>, vector<8x8xf32>,
    %c0_32 = arith.constant 0 : index
    %c0_33 = arith.constant 0 : index
    %45 = vector.load %arg16[%c0_32, %c0_33] : memref<8x1xf32, #tpu.memory_space<vmem>>, vector<8x1xf32>
    tpu.vector_store %arg16[%c0_32, %c0_33], %26 {strides = array<i32>} : memref<8x1xf32, #tpu.memory_space<vmem>>, vector<8x1xf32>,
    %c0_i32_34 = arith.constant 0 : i32
    %46 = arith.cmpi eq, %arg3, %c0_i32_34 : i32
    %47 = arith.extui %46 : i1 to i32
    %c0_i32_35 = arith.constant 0 : i32
    %48 = arith.cmpi ne, %47, %c0_i32_35 : i32
    scf.if %48 {
      %c0_36 = arith.constant 0 : index
      %c0_37 = arith.constant 0 : index
      %49 = vector.load %arg18[%c0_36, %c0_37] : memref<8x8xf32, #tpu.memory_space<vmem>>, vector<8x8xf32>
      %c0_38 = arith.constant 0 : index
      %c0_39 = arith.constant 0 : index
      %50 = vector.load %arg17[%c0_38, %c0_39] : memref<8x1xf32, #tpu.memory_space<vmem>>, vector<8x1xf32>
      %51 = tpu.reciprocal %50 {approx = true} : vector<8x1xf32> -> vector<8x1xf32>
      %52 = vector.broadcast %51 : vector<8x1xf32> to vector<8x8xf32>
      %53 = arith.mulf %49, %52 : vector<8x8xf32>
      %54 = arith.truncf %53 : vector<8x8xf32> to vector<8x8xbf16>
      %c0_40 = arith.constant 0 : index
      %c0_41 = arith.constant 0 : index
      %c0_42 = arith.constant 0 : index
      %55 = vector.load %arg12[%c0_40, %c0_41, %c0_42] : memref<1x8x32xbf16, #tpu.memory_space<vmem>>, vector<1x8x32xbf16>
      %56 = vector.shape_cast %55 : vector<1x8x32xbf16> to vector<8x32xbf16>
      %cst_43 = arith.constant dense<0.000000e+00> : vector<8x32xf32>
      %57 = tpu.matmul %54, %56, %cst_43 {dimension_numbers = #tpu.dot_dimension_numbers<[1], [0], [0], [1], [0, 0, 1, 1], [], []>} : vector<8x8xbf16>, vector<8x32xbf16>, vector<8x32xf32> -> vector<8x32xf32>
      %c0_i32_44 = arith.constant 0 : i32
      %58 = arith.cmpi eq, %arg2, %c0_i32_44 : i32
      %59 = arith.extui %58 : i1 to i32
      %c0_i32_45 = arith.constant 0 : i32
      %60 = arith.cmpi ne, %59, %c0_i32_45 : i32
      scf.if %60 {
        %c0_48 = arith.constant 0 : index
        %c0_49 = arith.constant 0 : index
        %64 = vector.load %arg13[%c0_48, %c0_49] : memref<1x32xf32, #tpu.memory_space<vmem>>, vector<1x32xf32>
        %65 = vector.broadcast %64 : vector<1x32xf32> to vector<8x32xf32>
        %66 = arith.addf %57, %65 : vector<8x32xf32>
        %c0_50 = arith.constant 0 : index
        %c0_51 = arith.constant 0 : index
        %c0_52 = arith.constant 0 : index
        %67 = vector.load %arg14[%c0_50, %c0_51, %c0_52] : memref<1x8x32xf32, #tpu.memory_space<vmem>>, vector<1x8x32xf32>
        %68 = vector.shape_cast %67 : vector<1x8x32xf32> to vector<8x32xf32>
        %69 = vector.shape_cast %66 : vector<8x32xf32> to vector<1x8x32xf32>
        tpu.vector_store %arg14[%c0_50, %c0_51, %c0_52], %69 {strides = array<i32>} : memref<1x8x32xf32, #tpu.memory_space<vmem>>, vector<1x8x32xf32>,
      } else {
      }
      %c0_i32_46 = arith.constant 0 : i32
      %61 = arith.cmpi sgt, %arg2, %c0_i32_46 : i32
      %62 = arith.extui %61 : i1 to i32
      %c0_i32_47 = arith.constant 0 : i32
      %63 = arith.cmpi ne, %62, %c0_i32_47 : i32
      scf.if %63 {
        %c0_48 = arith.constant 0 : index
        %c0_49 = arith.constant 0 : index
        %c0_50 = arith.constant 0 : index
        %64 = vector.load %arg14[%c0_48, %c0_49, %c0_50] : memref<1x8x32xf32, #tpu.memory_space<vmem>>, vector<1x8x32xf32>
        %65 = vector.shape_cast %64 : vector<1x8x32xf32> to vector<8x32xf32>
        %66 = arith.addf %65, %57 : vector<8x32xf32>
        %c0_51 = arith.constant 0 : index
        %c0_52 = arith.constant 0 : index
        %c0_53 = arith.constant 0 : index
        %67 = vector.load %arg14[%c0_51, %c0_52, %c0_53] : memref<1x8x32xf32, #tpu.memory_space<vmem>>, vector<1x8x32xf32>
        %68 = vector.shape_cast %67 : vector<1x8x32xf32> to vector<8x32xf32>
        %69 = vector.shape_cast %66 : vector<8x32xf32> to vector<1x8x32xf32>
        tpu.vector_store %arg14[%c0_51, %c0_52, %c0_53], %69 {strides = array<i32>} : memref<1x8x32xf32, #tpu.memory_space<vmem>>, vector<1x8x32xf32>,
      } else {
      }
    } else {
    }
    return
  }
  func.func @transform_0(%arg0: i32, %arg1: i32, %arg2: i32, %arg3: i32) -> (i32, i32, i32) {
    %c0_i32 = arith.constant 0 : i32
    %c0_i32_0 = arith.constant 0 : i32
    return %arg0, %arg1, %c0_i32 : i32, i32, i32
  }
  func.func @transform_1(%arg0: i32, %arg1: i32, %arg2: i32, %arg3: i32) -> (i32, i32, i32) {
    %c0_i32 = arith.constant 0 : i32
    %c0_i32_0 = arith.constant 0 : i32
    return %arg0, %arg3, %c0_i32 : i32, i32, i32
  }
  func.func @transform_2(%arg0: i32, %arg1: i32, %arg2: i32, %arg3: i32) -> (i32, i32, i32) {
    %c0_i32 = arith.constant 0 : i32
    %c0_i32_0 = arith.constant 0 : i32
    %c0_i32_1 = arith.constant 0 : i32
    return %arg2, %c0_i32, %c0_i32_0 : i32, i32, i32
  }
  func.func @transform_3(%arg0: i32, %arg1: i32, %arg2: i32, %arg3: i32) -> (i32, i32, i32) {
    %c0_i32 = arith.constant 0 : i32
    %c0_i32_0 = arith.constant 0 : i32
    %c0_i32_1 = arith.constant 0 : i32
    return %arg2, %c0_i32, %c0_i32_0 : i32, i32, i32
  }
  func.func @transform_4(%arg0: i32, %arg1: i32, %arg2: i32, %arg3: i32) -> (i32, i32, i32) {
    %c0_i32 = arith.constant 0 : i32
    %c0_i32_0 = arith.constant 0 : i32
    %c0_i32_1 = arith.constant 0 : i32
    return %arg2, %c0_i32, %c0_i32_0 : i32, i32, i32
  }
  func.func @transform_5(%arg0: i32, %arg1: i32, %arg2: i32, %arg3: i32) -> (i32, i32, i32) {
    %c0_i32 = arith.constant 0 : i32
    %c0_i32_0 = arith.constant 0 : i32
    %c0_i32_1 = arith.constant 0 : i32
    return %arg2, %c0_i32, %c0_i32_0 : i32, i32, i32
  }
  func.func @transform_6(%arg0: i32, %arg1: i32, %arg2: i32, %arg3: i32) -> (i32, i32, i32) {
    %c0_i32 = arith.constant 0 : i32
    %c0_i32_0 = arith.constant 0 : i32
    %c0_i32_1 = arith.constant 0 : i32
    return %arg2, %c0_i32, %c0_i32_0 : i32, i32, i32
  }
  func.func @transform_7(%arg0: i32, %arg1: i32, %arg2: i32, %arg3: i32) -> (i32, i32, i32) {
    %c0_i32 = arith.constant 0 : i32
    %c0_i32_0 = arith.constant 0 : i32
    %c0_i32_1 = arith.constant 0 : i32
    return %arg2, %c0_i32, %c0_i32_0 : i32, i32, i32
  }
  func.func @transform_8(%arg0: i32, %arg1: i32, %arg2: i32, %arg3: i32) -> (i32, i32, i32) {
    %c0_i32 = arith.constant 0 : i32
    %c0_i32_0 = arith.constant 0 : i32
    %c0_i32_1 = arith.constant 0 : i32
    return %arg2, %c0_i32, %c0_i32_0 : i32, i32, i32
  }
  func.func @transform_9(%arg0: i32, %arg1: i32, %arg2: i32, %arg3: i32) -> (i32, i32) {
    %c0_i32 = arith.constant 0 : i32
    %c0_i32_0 = arith.constant 0 : i32
    %c0_i32_1 = arith.constant 0 : i32
    return %c0_i32, %c0_i32_0 : i32, i32
  }
  func.func @transform_10(%arg0: i32, %arg1: i32, %arg2: i32, %arg3: i32) -> (i32, i32, i32) {
    %c0_i32 = arith.constant 0 : i32
    %c0_i32_0 = arith.constant 0 : i32
    return %arg0, %arg1, %c0_i32 : i32, i32, i32
  }
}

</mosaic_0001>

<bundles_post_ra>
// kernel: tpu_custom_call.1
= control target key start
LH: loop header
LB: loop body
LE: loop exit
PB: predicated region body
PF: predicated region fallthrough
CT: control target
= control target key end

     0   :  { %s1709_s0 = inlined_call_operand.vmem [shape: bf16[2,8,32], index: 0, kind: input, shape index: {}]   ;;  %s1710_s1 = inlined_call_operand.vmem [shape: bf16[2,8,32], index: 1, kind: input, shape index: {}]   ;;  %s1711_s2 = inlined_call_operand.vmem [shape: bf16[4,32,8], index: 2, kind: input, shape index: {}]   ;;  %s1712_s3 = inlined_call_operand.vmem [shape: bf16[4,32,8], index: 3, kind: input, shape index: {}]   ;;  %s1713_s4 = inlined_call_operand.vmem [shape: bf16[4,32,8], index: 4, kind: input, shape index: {}]   ;;  %s1714_s5 = inlined_call_operand.vmem [shape: f32[4,1,8], index: 5, kind: input, shape index: {}]   ;;  %s1715_s6 = inlined_call_operand.vmem [shape: f32[4,1,8], index: 6, kind: input, shape index: {}]   ;;  %s1716_s7 = inlined_call_operand.vmem [shape: f32[4,1,8], index: 7, kind: input, shape index: {}]   ;;  %s1717_s8 = inlined_call_operand.vmem [shape: bf16[4,8,32], index: 8, kind: input, shape index: {}]   ;;  %s1718_s9 = inlined_call_operand.vmem [shape: f32[1,32], index: 9, kind: input, shape index: {}]   ;;  %s1719_s10 = inlined_call_operand.hbm [shape: f32[2,8,32], index: 10, kind: output, shape index: {}]  }
   0x1   :  { %1726 = sst [smem:[#allocation16_spill]] %s1711_s2 }
   0x2   :  { %15 = vsyncpa [#allocation7], 0 }
   0x3   :  { %17 = vsyncpa [#allocation7 + $0x1], 0  ;;  %s1492_s13 = smov 0   ;;  %s1494_s14 = smov 0  }
   0x4   :  { %s1496_s15 = smov 0   ;;  %s1498_s16 = smov 0  }
   0x5   :  { %s1500_s17 = smov 0   ;;  %s1502_s18 = smov 0  }
   0x6   :  { %s1504_s19 = smov 0   ;;  %s1506_s20 = smov 0  }
   0x7 LB: > { %1727 = sst [smem:[#allocation9_spill]] %s1410_s15  ;;  %s1150_s21 = sadd.s32 4294967295, %s1430_s20   ;;  %s1430_s20 = sphi %s1506_s20, %s23_s20   ;;  %s1426_s19 = sphi %s1504_s19, %s1744_s19   ;;  %s1422_s18 = sphi %s1502_s18, %s1743_s18   ;;  %s1418_s17 = sphi %s1500_s17, %s1742_s17   ;;  %s1414_s16 = sphi %s1498_s16, %s1741_s16   ;;  %s1410_s15 = sphi %s1496_s15, %s1740_s15   ;;  %s1406_s14 = sphi %s1494_s14, %s1746_s14   ;;  %s1402_s13 = sphi %s1492_s13, %s1745_s13  }
   0x8   : > { %1728 = sst [smem:[#allocation10_spill]] %s1422_s18  ;;  %s1151_s22 = sadd.s32 4294967294, %s1430_s20  }
   0x9   : > { %1729 = sst [smem:[#allocation11_spill]] %s1426_s19  ;;  %s41_s23 = sadd.s32 1, %s1422_s18 }
   0xa   : > { %p43_p0 = scmp.ge.s32.totalorder %s41_s23, 4  ;;  %s49_s24 = sadd.s32 1, %s1426_s19 }
   0xb   : > { %p327_p1 = scmp.ne.s32.totalorder %s1410_s15, %s1406_s14  ;;  %p328_p2 = scmp.eq.s32.totalorder %s1150_s21, 7 }
   0xc   : > { %s1748_s23 = smov (%p43_p0, %s41_s23), 0  ;;  %s1750_s24 = smov (!%p43_p0, %s49_s24), %s1426_s19 }
   0xd   : > { %1730 = sst [smem:[#allocation12_spill]] %s1748_s23  ;;  %p1541_p3 = por %p328_p2, %p327_p1 }
   0xe   : > { %p333_p4 = scmp.ne.s32.totalorder %s1406_s14, %s1402_s13  ;;  %p51_p5 = scmp.ge.s32.totalorder %s1750_s24, 2 }
   0xf   : > { %p334_p6 = scmp.eq.s32.totalorder %s1151_s22, 7  ;;  %p1154_p7 = scmp.ge.s32.totalorder %s1430_s20, 1 }
  0x10   : > { %p424_p8 = scmp.lt.s32.totalorder %s1430_s20, 9  ;;  %s1752_s24 = smov (%p51_p5, %s1750_s24), 0 }
  0x11   : > { %1732 = sst [smem:[#allocation13_spill]] %s1752_s24  ;;  %p1551_p9 = por %p334_p6, %p333_p4 }
  0x12   : > { %p425_p10 = pnand %p1154_p7, %p424_p8  ;;  %s312_s27 = ssub.s32 %s1426_s19, %s1752_s24 }
  0x13   : > { %s1733_s26 = scalar_select %p1551_p9, 1, 0 }
  0x14   : > { %s317_s28 = sadd.s32 1, %s1410_s15  ;;  %p315_p11 = scmp.eq.s32.totalorder %s312_s27, 0  ;;  %v1432_v0 = vmov (!%p425_p10), 0.0   ;;  %vm1433_vm0 = vmmov (!%p425_p10), 0   ;;  %vm570_vm1 = vcmask (!%p425_p10), 261120   ;;  %vm620_vm2 = vcmask (!%p425_p10), 64512  }
  0x15   : > { %1734 = sst [smem:[#allocation14_spill]] %s1733_s26  ;;  %428 = sbr.rel (%p425_p10) target bundleno = 1311 (0x51f), region = 60  ;;  %1205 = vmatprep.subr.bf16.mxu0 (!%p425_p10), %v1432_v0  ;;  %1213 = vmatprep.subr.bf16.mxu1 (!%p425_p10), %v1432_v0  ;;  %621 = vst.msk [vmem:[#allocation5] sm:$0xff] (!%p425_p10), %vm620_vm2, %v1432_v0  ;;  %vm615_vm3 = vcmask (!%p425_p10), 60416   ;;  %vm617_vm4 = vcmask (!%p425_p10), 7168   ;;  %v1434_v24 = vmov (!%p425_p10), -inf  }
  0x16   : > { %s1559_s29 = scalar_select %p315_p11, %s1410_s15, %s317_s28  }
  0x17   : > { %s1720_s30 = sand.u32 (!%p425_p10), 1, %s1406_s14   ;;  %p513_p12 = scmp.lt.s32.totalorder (!%p425_p10), %s1414_s16, 3  ;;  %1209 = vmatprep.mubr.msk.bf16.mxu0 (!%p425_p10), %vm1433_vm0, %v1432_v0  ;;  %1217 = vmatprep.mubr.msk.bf16.mxu1 (!%p425_p10), %vm1433_vm0, %v1432_v0  ;;  %618 = vst.msk [vmem:[#allocation3] sm:$0xff] (!%p425_p10), %vm617_vm4, %v1434_v24  ;;  %619 = vst.msk [vmem:[#allocation4] sm:$0xff] (!%p425_p10), %vm617_vm4, %v1432_v0  ;;  %v1435_v31 = vmov (!%p425_p10), 0   ;;  %vm838_vm5 = vcmask (!%p425_p10), 1043456  }
  0x18   : > { %1735 = sst [smem:[#allocation15_spill]] %s1559_s29  ;;  %s1565_s11 = sshll.u32 (!%p425_p10), %s1720_s30, 3  ;;  %1322 = vset.pattern.permute.xlu0 (!%p425_p10), %v1435_v31  ;;  %1323 = vset.pattern.permute.xlu1 (!%p425_p10), %v1435_v31 }
  0x19   : > { %p499_p13 = scmp.lt.s32.totalorder (!%p425_p10), %s1418_s17, 1  ;;  %s1736_s2 = sld [smem:[#allocation16_spill]] (!%p425_p10) }
  0x1a   : > { %p1180_p0 = scmp.ne.s32.totalorder (!%p425_p10), %s1414_s16, 0 }
  0x1c   : > { %s1575_s12 = scalar_select %p513_p12, %s1414_s16, 3  ;;  %v827_v60 = vld [vmem:[#allocation5] sm:$0xff] }
  0x1d   : > { %s500_s21 = scalar_select %p499_p13, %s1418_s17, 1 }
  0x1e   : > { %s1187_s22 = sshll.u32 %s1575_s12, 4  ;;  %v803_v32 = vld [vmem:[#allocation3] sm:$0xff]  ;;  %s536_s27 = scalar_lea.vmem %s1716_s7, %s1575_s12  ;;  %v819_v54 = vld [vmem:[#allocation4] sm:$0xff] }
  0x1f   : > { %s517_s30 = scalar_lea.vmem %s1736_s2, %s1187_s22  ;;  %s522_s19 = scalar_lea.vmem %s1712_s3, %s1187_s22  ;;  %v1173_v37 = vld [vmem:[%s536_s27] ss:$0 sm:$0xff] }
  0x20   : > { %v1324_v1 = vld [vmem:[%s517_s30] sm:$0xff]   ;;  %s1156_s18 = sshll.u32 %s500_s21, 2  ;;  %v1326_v3 = vld [vmem:[%s517_s30 + $0x8] sm:$0xff]   ;;  %s1588_s26 = scalar_lea.vmem %s1713_s4, %s1187_s22 }
  0x21   : > { %v1325_v2 = vld [vmem:[%s522_s19] sm:$0xff]   ;;  %1206 = vmatpush3.bf16.msra.mxu0 %v1324_v1  ;;  %v1327_v4 = vld [vmem:[%s522_s19 + $0x8] sm:$0xff]   ;;  %s505_s2 = scalar_lea.vmem %s1709_s0, %s1156_s18  ;;  %s512_s30 = scalar_lea.vmem %s1710_s1, %s1156_s18 }
  0x22   : > { %1214 = vmatpush3.bf16.msra.mxu1 %v1325_v2  ;;  %1207 = vmatprep.subr.bf16.mxu0 %v1432_v0  ;;  %v546_v5 = vld [vmem:[%s505_s2] sm:$0xf]  ;;  %s530_s18 = scalar_lea.vmem %s1714_s5, %s1575_s12  ;;  %s533_s21 = scalar_lea.vmem %s1715_s6, %s1575_s12  ;;  %v1329_v25 = vld [vmem:[%s1588_s26 + $0x8] sm:$0xff]  }
  0x23   : > { %1215 = vmatprep.subr.bf16.mxu1 %v1432_v0  ;;  %v622_v6 = vld [vmem:[%s512_s30] sm:$0xf]  ;;  %s1164_s28 = sshll.u32 %s1575_s12, 2  ;;  %s498_s12 = scalar_lea.vmem [#allocation6], %s1565_s11 }
  0x24   : > { %v1165_v7 = vld [vmem:[%s530_s18] ss:$0 sm:$0xff]  ;;  %s540_s30 = scalar_lea.vmem %s1717_s8, %s1164_s28 }
  0x25   : > { %1208 = vmatpush3.bf16.msra.mxu0 %v1326_v3  ;;  %v1169_v8 = vld [vmem:[%s533_s21] ss:$0 sm:$0xff] }
  0x26   : > { %1216 = vmatpush3.bf16.msra.mxu1 %v1327_v4  ;;  %1221 = vmatprep.subr.bf16.mxu0 %v1432_v0  ;;  %v1328_v23 = vld [vmem:[%s1588_s26] sm:$0xff]  }
  0x27   : > { %1229 = vmatprep.subr.bf16.mxu1 %v1432_v0  ;;  %v898_v52 = vld [vmem:[%s540_s30] sm:$0xf] }
  0x28   : > { %1210 = vmatmul.mubr.msk.bf16.vlgmr.msra.gmra.mrb[0].mxu0 %vm570_vm1, %v546_v5  ;;  %v903_v53 = vsel %vm838_vm5, %v898_v52, 0 }
  0x29   : > { %1218 = vmatmul.mubr.msk.bf16.vlgmr.msra.gmra.mrb[0].mxu1 %vm570_vm1, %v622_v6  ;;  %1225 = vmatprep.mubr.msk.bf16.mxu0 %vm1433_vm0, %v1432_v0 }
  0x2a   : > { %1231 = vmatprep.mubr.msk.bf16.mxu1 %vm1433_vm0, %v1432_v0  ;;  %1222 = vmatpush3.bf16.msra.mxu0 %v1328_v23 }
  0x2b   : > { %1223 = vmatprep.subr.bf16.mxu0 %v1432_v0 }
  0x2e   : > { %1224 = vmatpush3.bf16.msra.mxu0 %v1329_v25 }
  0x2f   : > { %1235 = vmatprep.subr.bf16.mxu0 %v1432_v0 }
  0x31   : > { %1226 = vmatmul.mubr.msk.bf16.vlgmr.msra.gmra.mrb[4].mxu0 %vm570_vm1, %v622_v6 }
  0x32   : > { %1237 = vmatprep.mubr.msk.bf16.mxu0 %vm1433_vm0, %v1432_v0 }
  0xfb   : > { %v608_v9 = vpop.f32.mrb[0].mxu0 }
  0xfc   : > { %v609_v10 = vadd.f32 %v1165_v7, %v608_v9  ;;  %v684_v11 = vpop.f32.mrb[0].mxu1  ;;  %v1211_v12 = vpop.f32.mrb[1].mxu0 }
  0xfd   : > { %v685_v13 = vadd.f32 %v1169_v8, %v684_v11  ;;  %v1219_v14 = vpop.f32.mrb[1].mxu1  ;;  %v611_v15 = vpop.f32.mrb[2].mxu0  ;;  %v1181_v12 = vld [vmem:[%s1718_s9] ss:$0 sm:$0xff] (!%p1180_p0) }
  0xfe   : > { %v614_v16 = vpack.c.bf16 %v609_v10, %v609_v10  ;;  %v687_v17 = vpop.f32.mrb[2].mxu1  ;;  %v1212_v18 = vpop.f32.mrb[3].mxu0 }
  0xff   : > { %v690_v19 = vpack.c.bf16 %v685_v13, %v685_v13  ;;  %v1220_v20 = vpop.f32.mrb[3].mxu1 }
 0x100   : > { %616 = vst.msk [vmem:[#allocation2] sm:$0xf] %vm615_vm3, %v614_v16 }
 0x101   : > { %v761_v21 = vsel %vm620_vm2, %v690_v19, 0 }
 0x102   : > { %1230 = vmatpush3.bf16.xpose.msra.mxu1 %v761_v21 }
 0x103   : > { %1241 = vmatprep.subr.bf16.mxu1 %v1432_v0 }
 0x104   : > { %v748_v36 = vpop.f32.mrb[4].mxu0 }
 0x105   : > { %v1227_v38 = vpop.f32.mrb[5].mxu0  ;;  %v749_v39 = vadd.f32 %v1173_v37, %v748_v36 }
 0x106   : > { %v751_v40 = vpop.f32.mrb[6].mxu0 }
 0x107   : > { %v755_v22 = vld [vmem:[#allocation2] sm:$0xf]  ;;  %v1228_v41 = vpop.f32.mrb[7].mxu0  ;;  %v754_v42 = vpack.c.bf16 %v749_v39, %v749_v39 }
 0x109   : > { %1232 = vmatmul.mubr.msk.bf16.vlgmr.msra.gmra.mrb[4].mxu1 %vm620_vm2, %v755_v22  ;;  %v840_v43 = vsel %vm838_vm5, %v754_v42, 0 }
 0x10a   : > { %1243 = vmatprep.mubr.msk.bf16.mxu1 %vm1433_vm0, %v1432_v0  ;;  %1236 = vmatpush3.bf16.msra.mxu0 %v840_v43 }
 0x10b   : > { %1242 = vmatpush3.bf16.msra.mxu1 %v903_v53 }
 0x1dc   : > { %v797_v26 = vpop.f32.mrb[4].mxu1 }
 0x1dd   : > { %v1233_v27 = vpop.f32.mrb[5].mxu1  ;;  %v804_v28 = vsel %vm620_vm2, %v797_v26, -inf }
 0x1de   : > { %805 = vmax.xlane.f32.xlu0 %v804_v28  ;;  %v800_v29 = vpop.f32.mrb[6].mxu1 }
 0x1df   : > { %v1234_v30 = vpop.f32.mrb[7].mxu1 }
 0x26b   : > { %v806_v33 = vpop.xlane.xlu0 %805 }
 0x26c   : > { %v807_v34 = vmax.f32 %v803_v32, %v806_v33 }
 0x26e   : > { %v808_v35 = vsub.f32 %v803_v32, %v807_v34  ;;  %884 = vst.msk [vmem:[#allocation3] sm:$0xff] %vm617_vm4, %v807_v34  ;;  %813 = vperm.xlu0 %1322, %v807_v34  }
 0x270   : > { %v809_v50 = vmul.f32 1.442695, %v808_v35 }
 0x2ed   : > { %v814_v44 = vpop.permute.xlu0 %813 }
 0x2ee   : > { %v816_v45 = vsub.f32 %v797_v26, %v814_v44 }
 0x2f0   : > { %v817_v46 = vmul.f32 1.442695, %v816_v45 }
 0x2f2   : > { %1330 = vpow2.f32 %v817_v46 }
 0x2f3   : > { %1332 = vpow2.f32 %v809_v50 }
 0x2fc   : > { %v1331_v47 = vpop.eup %1330 }
 0x2fd   : > { %v821_v48 = vsel %vm620_vm2, %v1331_v47, 0.0  ;;  %v834_v49 = vpack.c.bf16 %v1331_v47, %v1331_v47  ;;  %v1333_v51 = vpop.eup %1332 }
 0x2fe   : > { %822 = vadd.xlane.f32.xlu1 %v821_v48  ;;  %v820_v55 = vmul.f32 %v1333_v51, %v819_v54 }
 0x2ff   : > { %1238 = vmatmul.mubr.msk.bf16.vlgmr.msra.gmra.mrb[8].mxu0 %vm620_vm2, %v834_v49 }
 0x30f   : > { %830 = vperm.xlu1 %1323, %v1333_v51  }
 0x38b   : > { %v823_v56 = vpop.xlane.xlu1 %822 }
 0x38c   : > { %v824_v57 = vadd.f32 %v823_v56, %v820_v55 }
 0x38e   : > { %826 = vst.msk [vmem:[#allocation4] sm:$0xff] %vm617_vm4, %v824_v57 }
 0x38f   : > { %v831_v61 = vpop.permute.xlu1 %830 }
 0x390   : > { %v833_v62 = vmul.f32 %v831_v61, %v827_v60 }
 0x395   : > { %v889_v58 = vld [vmem:[#allocation4] sm:$0xff] }
 0x396   : > { %1334 = vrcp.f32 %v889_v58 }
 0x3a0   : > { %v1335_v59 = vpop.eup %1334 }
 0x3a1   : > { %893 = vperm.xlu1 %1323, %v1335_v59  }
 0x3d2   : > { %v876_v63 = vpop.f32.mrb[8].mxu0 }
 0x3d3   : > { %v882_v0 = vadd.f32 %v876_v63, %v833_v62  ;;  %v1239_v1 = vpop.f32.mrb[9].mxu0 }
 0x3d4   : > { %v879_v2 = vpop.f32.mrb[10].mxu0 }
 0x3d5   : > { %883 = vst.msk [vmem:[#allocation5] sm:$0xff] %vm620_vm2, %v882_v0  ;;  %v1240_v3 = vpop.f32.mrb[11].mxu0 }
 0x3dc   : > { %v888_v5 = vld [vmem:[#allocation5] sm:$0xff] }
 0x420   : > { %v894_v4 = vpop.permute.xlu1 %893 }
 0x421   : > { %v896_v6 = vmul.f32 %v894_v4, %v888_v5 }
 0x423   : > { %v897_v7 = vpack.c.bf16 %v896_v6, %v896_v6 }
 0x425   : > { %1244 = vmatmul.mubr.msk.bf16.vlgmr.msra.gmra.mrb[8].mxu1 %vm620_vm2, %v897_v7 }
 0x4f5   : > { %948 = sbr.rel (%p1180_p0) target bundleno = 1276 (0x4fc), region = 72 }
 0x4f8   : > { %v939_v8 = vpop.f32.mrb[8].mxu1 }
 0x4f9   : > { %v1245_v9 = vpop.f32.mrb[9].mxu1  ;;  %v956_v13 = vadd.f32 (!%p1180_p0), %v1181_v12, %v939_v8 }
 0x4fa   : > { %v942_v10 = vpop.f32.mrb[10].mxu1 }
 0x4fb   : > { %v1246_v11 = vpop.f32.mrb[11].mxu1  ;;  %957 = vst.msk [vmem:[%s498_s12] sm:$0xff] (!%p1180_p0), %vm570_vm1, %v956_v13 }
 0x4fc PF: > { %p1182_p1 = scmp.le.s32.totalorder %s1414_s16, 0 }
 0x4fe   : > { %961 = sbr.rel (%p1182_p1) target bundleno = 1286 (0x506), region = 76 }
 0x502   : > { %v962_v14 = vld [vmem:[%s498_s12] sm:$0xff] (!%p1182_p1) }
 0x503   : > { %v963_v15 = vadd.f32 (!%p1182_p1), %v962_v14, %v939_v8 }
 0x505   : > { %964 = vst.msk [vmem:[%s498_s12] sm:$0xff] %vm570_vm1, %v963_v15 }
 0x506 PF: > { %s1184_s11 = sshll.u32 %s1418_s17, 7  ;;  %s980_s21 = sshll.u32 %s498_s12, 4  ;;  %s981_s21 = int_to_ptr.vmem [resolvable:$true] %s980_s21 }
 0x507   : > { %s1660_s29 = scalar_lea.hbm %s1719_s10, %s1184_s11  ;;  %s1737_s26 = sand.u32 1, %s1406_s14  }
 0x508   : > { %s966_s22 = scalar_lea.sflag [#allocation7], %s1737_s26  ;;  %s1336_s16 = scalar_lea.vmem %s981_s21, 128 }
 0x509   : > { %p1337_p2 = scmp.ne.s32.totalorder %s981_s21, %s1336_s16  ;;  %s1436_s27 = smov [#allocation6]  }
 0x50a   : > { %s1340_s28 = sshll.u32 %s1436_s27, 4  ;;  %s1341_s28 = int_to_ptr.vmem [resolvable:$false] %s1340_s28 }
 0x50b   : > { %p1338_p4 = pnand %p1337_p2, %p1541_p3  ;;  %s1342_s23 = scalar_lea.vmem %s1341_s28, 256 }
 0x50c   : > { %p1343_p6 = scmp.lt.s32.totalorder %s981_s21, %s1341_s28  ;;  %p1344_p7 = scmp.lt.s32.totalorder %s1342_s23, %s1336_s16 }
 0x50d   : > { %p1339_p5 = pneg %p1338_p4 }
 0x50e   : > { %p1345_p8 = por %p1344_p7, %p1343_p6 }
 0x510   : > { %p1346_p10 = pnand %p1345_p8, %p1339_p5 }
 0x512   : > { %1349 = shalt.err (!%p1346_p10)
}
 0x513   : > { %s1350_s17 = scalar_lea.hbm %s1660_s29, 128  ;;  %s1354_s12 = scalar_lea.hbm %s1719_s10, 256 }
 0x514   : > { %p1351_p11 = scmp.ne.s32.totalorder %s1660_s29, %s1350_s17  ;;  %p1355_p0 = scmp.lt.u32.totalorder %s1660_s29, %s1719_s10 }
 0x515   : > { %p1356_p1 = scmp.lt.u32.totalorder %s1354_s12, %s1350_s17  ;;  %p1358_p4 = scmp.lt.u32.totalorder %s1350_s17, %s1660_s29 }
 0x516   : > { %p1352_p12 = pnand %p1351_p11, %p1541_p3 }
 0x517   : > { %p1357_p2 = por %p1356_p1, %p1355_p0 }
 0x518   : > { %p1353_p13 = pneg %p1352_p12 }
 0x519   : > { %p1359_p5 = por %p1358_p4, %p1357_p2 }
 0x51b   : > { %p1360_p6 = pnand %p1359_p5, %p1353_p13 }
 0x51d   : > { %1363 = shalt.err (!%p1360_p6)
}
 0x51e   : > { %1247 = dma.vmem_to_hbm [thread:$0]  (%p1541_p3), %s981_s21, 128, %s1660_s29, %s966_s22  }
 0x51f PF: > { %p1253_p7 = scmp.ge.s32.totalorder %s1430_s20, 2  ;;  %s992_s18 = sand.u32 1, %s1402_s13  }
 0x520   : > { %s993_s19 = scalar_lea.sflag [#allocation7], %s992_s18 }
 0x521   : > { %p1250_p8 = pnand %p1253_p7, %p1551_p9 }
 0x523   : > { %1397 = dma.done.wait (!%p1250_p8), %s993_s19, 128  }
 0x524   : > { %1399 = vsyncadd (!%p1250_p8), %s993_s19, 4294967168  ;;  %s23_s20 = sadd.s32 1, %s1430_s20   ;;  %s1739_s26 = sld [smem:[#allocation9_spill]] }
 0x525   : > { %p20_p10 = scmp.ge.s32.totalorder %s23_s20, 10   ;;  %s1740_s15 = sld [smem:[#allocation15_spill]] }
 0x526   : > { %s1741_s16 = sld [smem:[#allocation10_spill]]  ;;  %s1742_s17 = sld [smem:[#allocation11_spill]] }
 0x527   : > { %s1743_s18 = sld [smem:[#allocation12_spill]]  ;;  %s1744_s19 = sld [smem:[#allocation13_spill]] }
 0x528   : > { %s1745_s13 = smov %s1406_s14  ;;  %22 = sbr.rel (!%p20_p10) target bundleno = 7 (0x7), region = 135 }
 0x52a   : > { %s1746_s14 = smov %s1739_s26 }
 0x52f   :  { %998 = vsyncpa [#allocation7], 1 }
 0x530   :  { %1000 = vsyncpa [#allocation7 + $0x1], 1 }

</bundles_post_ra>
